<compile_context>
chip_gen: v6e
topology: v6e:2x2x1
jax: 0.10.0
libtpu: 0.0.40
codegen_flags: <defaults>
</compile_context>

<pallas_src>
import math

import jax
import jax.numpy as jnp
from jax.experimental import pallas as pl
from jax.experimental.pallas import tpu as pltpu


# --------------------------------------------------------------------------------------
# Kernel: one lane-dense elementwise add tile.
# --------------------------------------------------------------------------------------
def _pe_add_kernel(x_ref, pe_ref, o_ref):
    # x_ref / pe_ref / o_ref: (ts, B*D) VMEM tiles.
    o_ref[...] = x_ref[...] + pe_ref[...]


# --------------------------------------------------------------------------------------
# Setup-time table construction (mirrors the PyTorch __init__).
# --------------------------------------------------------------------------------------
def make_positional_encoding_table(d_model: int, max_len: int,
                                   dtype=jnp.float32) -> jnp.ndarray:
    """Builds the (max_len, 1, d_model) sinusoidal table, matching the PyTorch buffer."""
    assert d_model % 2 == 0, "d_model must be even (same restriction as the PyTorch module)"
    position = jnp.arange(0, max_len, dtype=jnp.float32)[:, None]               # (max_len, 1)
    div_term = jnp.exp(
        jnp.arange(0, d_model, 2, dtype=jnp.float32) * (-math.log(10000.0) / d_model)
    )                                                                            # (d_model/2,)
    pe = jnp.zeros((max_len, d_model), dtype=jnp.float32)
    pe = pe.at[:, 0::2].set(jnp.sin(position * div_term))
    pe = pe.at[:, 1::2].set(jnp.cos(position * div_term))
    return pe[:, None, :].astype(dtype)                                          # (max_len, 1, d_model)


def broadcast_pe_for_batch(pe: jnp.ndarray, batch: int) -> jnp.ndarray:
    """One-time setup: (max_len, 1, D) -> lane-dense (max_len, batch*D) table."""
    max_len, one, d = pe.shape
    assert one == 1
    return jnp.broadcast_to(pe, (max_len, batch, d)).reshape(max_len, batch * d)


# --------------------------------------------------------------------------------------
# Generation-aware tile selection.
# --------------------------------------------------------------------------------------
def _chip_generation():
    try:
        kind = jax.devices()[0].device_kind.lower()
    except Exception:
        return None
    for gen in (7, 6, 5):
        if f"v{gen}" in kind:
            return gen
    return None


def _round_down(x: int, m: int) -> int:
    return (x // m) * m


def _tile_config(S: int, row_bytes: int, itemsize: int):
    """Pick (tile_seq, vmem_limit_bytes) for the flattened (S, B*D) layout."""
    gen = _chip_generation()
    if gen is not None and gen >= 7:
        # v7x: 3.2 TB/s HBM, 64 MiB VMEM -> bigger tiles + more grid steps for 2 TCs.
        target_bytes, vmem_limit, min_steps = 8 << 20, 48 << 20, 8
    elif gen == 6:
        target_bytes, vmem_limit, min_steps = 4 << 20, 32 << 20, 2
    else:
        # v5e / unknown: stay within the 16 MiB scoped-VMEM default.
        target_bytes, vmem_limit, min_steps = 2 << 20, None, 2

    sub = max(1, 32 // itemsize)                       # sublane multiple: 8 f32, 16 bf16
    ts = max(sub, target_bytes // max(1, row_bytes))
    # Keep at least `min_steps` grid steps when S is large enough (v7x dual-TC sharding).
    if S >= min_steps * sub:
        ts = min(ts, max(sub, _round_down(pl.cdiv(S, min_steps), sub)))
    ts = max(sub, _round_down(min(ts, S), sub))
    ts = min(ts, S)
    # Prefer a ts that divides S (unmasked last tile), without shrinking below ts/2.
    if ts >= sub:
        for cand in range(ts, max(sub, ts // 2) - 1, -sub):
            if S % cand == 0:
                ts = cand
                break
    return int(ts), vmem_limit


# --------------------------------------------------------------------------------------
# Forward.
# --------------------------------------------------------------------------------------
def positional_encoding_forward(x: jnp.ndarray, pe_flat: jnp.ndarray, *,
                                tile_seq: int | None = None,
                                use_pallas: bool | None = None) -> jnp.ndarray:
    """x: (S, B, D).  pe_flat: (max_len, B*D) pre-broadcast table in x.dtype.

    Returns x + pe[:S] (dropout p=0 => identity).
    """
    S, B, D = x.shape
    BD = B * D
    assert pe_flat.ndim == 2 and pe_flat.shape[0] >= S and pe_flat.shape[1] == BD
    assert pe_flat.dtype == x.dtype, "build/broadcast the pe table in x's dtype at setup"

    itemsize = jnp.dtype(x.dtype).itemsize

    # Tiny-input fallback: pallas_call fixed cost dominates below ~1 MiB.
    if use_pallas is None:
        use_pallas = S * BD * itemsize >= (1 << 20)
    if not use_pallas:
        return x + pe_flat[:S].reshape(S, B, D)

    # Flatten to a lane-dense 2-D layout; (S, B, D) -> (S, B*D) is a no-op reshape.
    x2 = x.reshape(S, BD)
    row_bytes = BD * itemsize
    sub = max(1, 32 // itemsize)

    if tile_seq is not None:
        ts = max(1, min(int(tile_seq), S))
        if S >= sub:
            ts = max(sub, _round_down(ts, sub))          # keep sublane alignment
        ts = min(ts, S)
        vmem_limit = None
    else:
        ts, vmem_limit = _tile_config(S, row_bytes, itemsize)

    # pe's sublane block dim must be 8-aligned or equal pe's full extent; only when
    # S < 8 does ts == S fall below alignment, in which case slice pe to S rows.
    pe2 = pe_flat if ts % 8 == 0 else pe_flat[:S]

    grid = (pl.cdiv(S, ts),)

    cost = pl.CostEstimate(
        flops=S * BD,
        transcendentals=0,
        bytes_accessed=3 * S * BD * itemsize,            # x read + pe read + out write
    )

    cp_kwargs = dict(dimension_semantics=("parallel",))  # independent seq tiles -> 2 TCs on v7x
    if vmem_limit is not None:
        cp_kwargs["vmem_limit_bytes"] = int(vmem_limit)

    out2 = pl.pallas_call(
        _pe_add_kernel,
        out_shape=jax.ShapeDtypeStruct((S, BD), x.dtype),
        grid_spec=pl.GridSpec(
            grid=grid,
            in_specs=[
                pl.BlockSpec((ts, BD), lambda i: (i, 0)),   # x tile
                pl.BlockSpec((ts, BD), lambda i: (i, 0)),   # pe tile (same row window)
            ],
            out_specs=pl.BlockSpec((ts, BD), lambda i: (i, 0)),
        ),
        compiler_params=pltpu.CompilerParams(**cp_kwargs),
        cost_estimate=cost,
        input_output_aliases={0: 0},                      # reuse x's buffer when donated
    )(x2, pe2)

    return out2.reshape(S, B, D)


if __name__ == "__main__":
    # Small shapes consistent with the module's forward: (seq, batch, d_model)
    seq_len, batch, d_model = 16, 2, 32
    max_len = 64

    key = jax.random.PRNGKey(0)
    x = jax.random.normal(key, (seq_len, batch, d_model), dtype=jnp.float32)

    # Setup-time (matches PyTorch __init__), done once:
    pe = make_positional_encoding_table(d_model, max_len, dtype=x.dtype)   # (max_len, 1, D)
    pe_flat = broadcast_pe_for_batch(pe, batch)                            # (max_len, B*D)

    # Pure-JAX reference of the PyTorch forward, computed BEFORE the kernel call
    # (x is donated into the kernel output).
    ref = x + pe[:seq_len]

    fwd = jax.jit(positional_encoding_forward,
                  static_argnames=("tile_seq", "use_pallas"),
                  donate_argnums=(0,))

    # Force the Pallas path even at this tiny demo size so the kernel itself is exercised
    # (production sizes take it automatically via the >= 1 MiB heuristic).
    out = fwd(x, pe_flat, use_pallas=True)
    out = jax.block_until_ready(out)

    assert out.shape == (seq_len, batch, d_model)
    assert jnp.allclose(out, ref, atol=1e-6, rtol=1e-6)

    print("KERNEL_OK")
</pallas_src>

<mosaic_0001>
module attributes {stable_mosaic.version = 11 : i64} {
  func.func @_pe_add_kernel(%arg0: i32, %arg1: memref<8x64xf32, #tpu.memory_space<vmem>>, %arg2: memref<8x64xf32, #tpu.memory_space<vmem>>, %arg3: memref<8x64xf32, #tpu.memory_space<vmem>>) attributes {dimension_semantics = [#tpu.dimension_semantics<parallel>], iteration_bounds = array<i64: 2>, scalar_prefetch = 0 : i64, scratch_operands = 0 : i64, tpu.core_type = #tpu.core_type<tc>, window_params = [{transform_indices = @transform_0, window_bounds = array<i64: 8, 64>}, {transform_indices = @transform_1, window_bounds = array<i64: 8, 64>}, {transform_indices = @transform_2, window_bounds = array<i64: 8, 64>}]} {
    %c0 = arith.constant 0 : index
    %c0_0 = arith.constant 0 : index
    %0 = vector.load %arg1[%c0, %c0_0] : memref<8x64xf32, #tpu.memory_space<vmem>>, vector<8x64xf32>
    %c0_1 = arith.constant 0 : index
    %c0_2 = arith.constant 0 : index
    %1 = vector.load %arg2[%c0_1, %c0_2] : memref<8x64xf32, #tpu.memory_space<vmem>>, vector<8x64xf32>
    %2 = arith.addf %0, %1 : vector<8x64xf32>
    %c0_3 = arith.constant 0 : index
    %c0_4 = arith.constant 0 : index
    %3 = vector.load %arg3[%c0_3, %c0_4] : memref<8x64xf32, #tpu.memory_space<vmem>>, vector<8x64xf32>
    tpu.vector_store %arg3[%c0_3, %c0_4], %2 {strides = array<i32>} : memref<8x64xf32, #tpu.memory_space<vmem>>, vector<8x64xf32>,
    return
  }
  func.func @transform_0(%arg0: i32) -> (i32, i32) {
    %c0_i32 = arith.constant 0 : i32
    %c0_i32_0 = arith.constant 0 : i32
    return %arg0, %c0_i32 : i32, i32
  }
  func.func @transform_1(%arg0: i32) -> (i32, i32) {
    %c0_i32 = arith.constant 0 : i32
    %c0_i32_0 = arith.constant 0 : i32
    return %arg0, %c0_i32 : i32, i32
  }
  func.func @transform_2(%arg0: i32) -> (i32, i32) {
    %c0_i32 = arith.constant 0 : i32
    %c0_i32_0 = arith.constant 0 : i32
    return %arg0, %c0_i32 : i32, i32
  }
}

</mosaic_0001>

<bundles_post_ra>
// kernel: positional_encoding_forward.1
= control target key start
LH: loop header
LB: loop body
LE: loop exit
PB: predicated region body
PF: predicated region fallthrough
CT: control target
= control target key end

     0   :  { %7 = vsyncpa [#allocation3], 0  ;;  %s491_s0 = inlined_call_operand.vmem [shape: f32[16,64], index: 0, kind: input, shape index: {}, may-alias: {0,2}]   ;;  %s492_s1 = inlined_call_operand.hbm [shape: f32[64,64], index: 1, kind: input, shape index: {}]   ;;  %s493_s2 = inlined_call_operand.vmem [shape: f32[16,64], index: 2, kind: output, shape index: {}, may-alias: {0,2}]  }
   0x1   :  { %9 = vsyncpa [#allocation3 + $0x1], 0  ;;  %s388_s9 = smov 0   ;;  %s390_s10 = smov 0  }
   0x2   :  { %s392_s11 = smov 0   ;;  %s394_s12 = smov 0  }
   0x3 LB: > { %s407_s13 = sadd.s32 4294967295, %s370_s12   ;;  %s410_s14 = sadd.s32 1, %s370_s12   ;;  %s370_s12 = sphi %s394_s12, %s503_s12   ;;  %s366_s11 = sphi %s392_s11, %s502_s11   ;;  %s362_s10 = sphi %s390_s10, %s501_s10   ;;  %s358_s9 = sphi %s388_s9, %s500_s9  }
   0x4   : > { %s45_s15 = ssub.s32 %s370_s12, %s410_s14  ;;  %s48_s16 = sadd.s32 1, %s366_s11 }
   0x5   : > { %p46_p0 = scmp.eq.s32.totalorder %s45_s15, 0  ;;  %p55_p1 = scmp.ne.s32.totalorder %s366_s11, %s362_s10 }
   0x6   : > { %p56_p2 = scmp.eq.s32.totalorder %s370_s12, 0  ;;  %p61_p3 = scmp.ne.s32.totalorder %s362_s10, %s358_s9 }
   0x7   : > { %s420_s17 = scalar_select %p46_p0, %s366_s11, %s48_s16  }
   0x8   : > { %p57_p4 = por %p56_p2, %p55_p1  ;;  %p62_p5 = scmp.eq.s32.totalorder %s407_s13, 0 }
   0x9   : > { %p275_p6 = scmp.lt.s32.totalorder %s370_s12, 2  ;;  %s118_s19 = sand.u32 1, %s366_s11  }
   0xa   : > { %p424_p7 = por %p62_p5, %p61_p3  ;;  %s261_s20 = sshll.u32 %s118_s19, 3 }
   0xb   : > { %s262_s21 = sshll.u32 %s370_s12, 7  ;;  %s122_s25 = scalar_lea.vmem [#allocation2], %s261_s20 }
   0xc   : > { %s495_s18 = scalar_select %p424_p7, 1, 0 }
   0xd   : > { %s433_s24 = scalar_lea.hbm %s492_s1, %s262_s21  ;;  %s129_s26 = sshll.u32 %s122_s25, 4  ;;  %s435_s26 = int_to_ptr.vmem [resolvable:$true] %s129_s26 }
   0xe   : > { %p437_p8 = pnand %p275_p6, %p57_p4  ;;  %s119_s28 = scalar_lea.sflag [#allocation3], %s118_s19 }
   0xf   : > { %s308_s29 = scalar_lea.hbm %s433_s24, 128  ;;  %s313_s4 = scalar_lea.hbm %s492_s1, 1024 }
  0x10   : > { %p309_p11 = scmp.ne.s32.totalorder %s433_s24, %s308_s29  ;;  %p310_p12 = pneg %p437_p8 }
  0x11   : > { %p314_p1 = scmp.lt.s32.totalorder %s433_s24, %s492_s1  ;;  %p315_p2 = scmp.lt.s32.totalorder %s313_s4, %s308_s29 }
  0x12   : > { %p311_p13 = pnand %p310_p12, %p309_p11 }
  0x13   : > { %p316_p3 = por %p315_p2, %p314_p1 }
  0x14   : > { %p312_p0 = pneg %p311_p13 }
  0x16   : > { %p317_p4 = pnand %p316_p3, %p312_p0 }
  0x18   : > { %320 = shalt.err (!%p317_p4)
}
  0x19   : > { %s321_s7 = scalar_lea.vmem %s435_s26, 128  ;;  %s372_s8 = smov [#allocation2]  }
  0x1a   : > { %p322_p5 = scmp.ne.s32.totalorder %s435_s26, %s321_s7  ;;  %s326_s9 = sshll.u32 %s372_s8, 4  ;;  %s327_s9 = int_to_ptr.vmem [resolvable:$false] %s326_s9 }
  0x1b   : > { %s328_s15 = scalar_lea.vmem %s327_s9, 256  ;;  %p329_p13 = scmp.lt.s32.totalorder %s435_s26, %s327_s9 }
  0x1c   : > { %p324_p6 = pnand %p322_p5, %p310_p12  ;;  %p330_p9 = scmp.lt.s32.totalorder %s328_s15, %s321_s7 }
  0x1e   : > { %p325_p11 = pneg %p324_p6  ;;  %p331_p10 = por %p330_p9, %p329_p13 }
  0x20   : > { %p332_p7 = pnand %p331_p10, %p325_p11 }
  0x22   : > { %335 = shalt.err (!%p332_p7)
}
  0x23   : > { %274 = dma.hbm_to_vmem [thread:$0]  (!%p437_p8), %s433_s24, 128, %s435_s26, %s119_s28  }
  0x24   : > { %p497_p0 = scmp.lt.s32.totalorder %s370_s12, 3  ;;  %p498_p1 = scmp.ge.s32.totalorder %s370_s12, 1 }
  0x26   : > { %p135_p12 = pnand %p498_p1, %p497_p0 }
  0x27   : > { %s140_s16 = sand.u32 (!%p135_p12), 1, %s362_s10   ;;  %p499_p9 = scmp.ne.s32.totalorder (!%p135_p12), %s495_s18, 0 }
  0x28   : > { %138 = sbr.rel (%p135_p12) target bundleno = 55 (0x37), region = 28  ;;  %s264_s19 = sshll.u32 (!%p135_p12), %s140_s16, 3 }
  0x29   : > { %s141_s20 = scalar_lea.sflag (!%p135_p12), [#allocation3], %s140_s16  ;;  %s144_s21 = scalar_lea.vmem (!%p135_p12), [#allocation2], %s264_s19 }
  0x2d   : > { %353 = dma.done.wait (%p499_p9), %s141_s20, 128  }
  0x2e   : > { %355 = vsyncadd (%p499_p9), %s141_s20, 4294967168  ;;  %p168_p7 = scmp.lt.s32.totalorder %s407_s13, 1  ;;  %v177_v1 = vld [vmem:[%s144_s21] sm:$0xff]  ;;  %vm179_vm0 = vcmask 523264  }
  0x30   : > { %s505_s13 = smov (!%p168_p7, %s407_s13), 1 }
  0x31   : > { %s265_s22 = sshll.u32 %s505_s13, 3 }
  0x32   : > { %s171_s24 = scalar_lea.vmem %s491_s0, %s265_s22  ;;  %s175_s27 = scalar_lea.vmem %s493_s2, %s265_s22 }
  0x33   : > { %v176_v0 = vld [vmem:[%s171_s24] sm:$0xff] }
  0x34   : > { %v178_v2 = vadd.f32 %v177_v1, %v176_v0 }
  0x36   : > { %180 = vst.msk [vmem:[%s175_s27] sm:$0xff] %vm179_vm0, %v178_v2 }
  0x37 PF: > { %p12_p8 = scmp.ge.s32.totalorder %s410_s14, 4   ;;  %s500_s9 = smov %s362_s10 }
  0x38   : > { %s501_s10 = smov %s366_s11  ;;  %s502_s11 = smov %s420_s17 }
  0x39   : > { %s503_s12 = smov %s410_s14  ;;  %14 = sbr.rel (!%p12_p8) target bundleno = 3 (0x3), region = 71 }
  0x3e   :  { %200 = vsyncpa [#allocation3], 1 }
  0x3f   :  { %202 = vsyncpa [#allocation3 + $0x1], 1 }

</bundles_post_ra>
